<compile_context>
chip_gen: v7x
topology: tpu7x:2x2x1
jax: 0.10.0
libtpu: 0.0.40
codegen_flags: <defaults>
</compile_context>

<pallas_src>
import jax
import jax.numpy as jnp
from jax.experimental import pallas as pl
from jax.experimental.pallas import tpu as pltpu

LATENT_DIM = 128
HIDDEN = 64
OUT = 3

# dot_general dimension numbers for A @ B^T (contract last dims of both).
NT_DIM_NUMBERS = (((1,), (1,)), ((), ()))


def _round_up(n, m):
    return ((n + m - 1) // m) * m


def motion_decoder_kernel(x_ref, w1_ref, b1_ref, w2t_ref, b2_ref, o_ref):
    # x_ref:   (tb, 128)   input latents tile
    # w1_ref:  (128, 64)   first layer weight, (in, out) layout
    # b1_ref:  (1, 64)
    # w2t_ref: (3, 64)     second layer weight, (out, in) layout
    # b2_ref:  (3, 1)
    # o_ref:   (3, tb)     transposed, lane-dense output tile
    x = x_ref[...]
    h = jnp.dot(x, w1_ref[...], preferred_element_type=jnp.float32)
    h = jnp.maximum(h + b1_ref[...], 0.0)                     # bias + ReLU (VPU, f32)
    # (3, tb) = (3, 64) @ (tb, 64)^T -- transposed-RHS matmul on the MXU.
    y_t = jax.lax.dot_general(
        w2t_ref[...], h, dimension_numbers=NT_DIM_NUMBERS,
        preferred_element_type=jnp.float32)
    y_t = y_t + b2_ref[...]
    o_ref[...] = y_t.astype(o_ref.dtype)


def _choose_tile(B, block_batch):
    """Rows per grid step.

    Small batches -> a single block whose shape equals the full array (no
    padding/alignment needed). Otherwise tb is a multiple of 128 (lane dim of
    the transposed output / sublane dim of x), sized so the grid has >= 2 steps
    (v7x megacore) while staying <= block_batch.
    """
    MIN_SPLIT = 256
    if B < MIN_SPLIT:
        return B
    n_steps = max(2, pl.cdiv(B, block_batch))
    tb = _round_up(pl.cdiv(B, n_steps), 128)
    return min(tb, _round_up(B, 128))


def motion_decoder(x, w1, b1, w2t, b2, *, block_batch=4096, transposed_output=False):
    """Forward pass of MotionDecoder.

    x: (B, 128) float32 or bfloat16. Returns (B, 3) in x.dtype
    (or (3, B) if transposed_output=True, for lane-dense consumers).
    """
    B, D = x.shape
    assert D == LATENT_DIM
    out_dtype = x.dtype

    # Match W1 to the input dtype (32 KiB -> negligible). We deliberately do NOT
    # cast x here: that would add a full extra HBM pass over the dominant stream.
    w1 = w1.astype(x.dtype)

    tb = _choose_tile(B, block_batch)
    grid = (pl.cdiv(B, tb),)

    itemsize_x = jnp.dtype(x.dtype).itemsize
    cost = pl.CostEstimate(
        flops=2 * B * (LATENT_DIM * HIDDEN + HIDDEN * OUT),
        transcendentals=0,
        bytes_accessed=(B * LATENT_DIM * itemsize_x
                        + B * OUT * jnp.dtype(out_dtype).itemsize
                        + LATENT_DIM * HIDDEN * jnp.dtype(w1.dtype).itemsize
                        + (HIDDEN + OUT * HIDDEN + OUT) * 4),
    )

    # Real footprint: double-buffered x tile + double-buffered (sublane-padded)
    # output tile + f32 hidden temps + resident weights, with 2x headroom.
    # Clamp to [8 MiB, 40 MiB] so v7x's 64 MiB part keeps compiler scratch room.
    tb_pad = _round_up(max(tb, 8), 128)
    footprint = (2 * tb * LATENT_DIM * itemsize_x      # x tile, double buffered
                 + 2 * 8 * tb_pad * 4                  # (3, tb) out, padded to 8 sublanes
                 + 2 * tb_pad * LATENT_DIM * 4         # f32 hidden temps
                 + (1 << 19))                          # weights + misc
    vmem_bytes = int(min(40 << 20, max(8 << 20, 2 * footprint)))

    out_t = pl.pallas_call(
        motion_decoder_kernel,
        out_shape=jax.ShapeDtypeStruct((OUT, B), out_dtype),
        grid_spec=pl.GridSpec(
            grid=grid,
            in_specs=[
                pl.BlockSpec((tb, LATENT_DIM), lambda i: (i, 0)),       # x tile
                pl.BlockSpec((LATENT_DIM, HIDDEN), lambda i: (0, 0)),   # W1 (resident)
                pl.BlockSpec((1, HIDDEN), lambda i: (0, 0)),            # b1 (resident)
                pl.BlockSpec((OUT, HIDDEN), lambda i: (0, 0)),          # W2 (out,in) (resident)
                pl.BlockSpec((OUT, 1), lambda i: (0, 0)),               # b2 (resident)
            ],
            out_specs=pl.BlockSpec((OUT, tb), lambda i: (0, i)),        # lane-dense (3, tb)
        ),
        compiler_params=pltpu.CompilerParams(
            dimension_semantics=("parallel",),
            vmem_limit_bytes=vmem_bytes,
        ),
        cost_estimate=cost,
    )(x, w1, b1, w2t, b2)

    if transposed_output:
        return out_t
    # (3, B) -> (B, 3): tiny (12 B/row) consumer-side transpose; keeps the
    # kernel's store path lane-dense.
    return out_t.T
    # TODO(synk): for maximum effect, fuse this decoder as an epilogue of the
    # kernel that produces the (B, 128) latents and skip the x HBM round trip.


def init_params(key):
    """nn.Linear-style init (uniform +/- 1/sqrt(fan_in)), in kernel-friendly layouts."""
    k1, k2, k3, k4 = jax.random.split(key, 4)
    bound1 = 1.0 / jnp.sqrt(LATENT_DIM)
    bound2 = 1.0 / jnp.sqrt(HIDDEN)
    w1 = jax.random.uniform(k1, (LATENT_DIM, HIDDEN), jnp.float32, -bound1, bound1)  # (in, out)
    b1 = jax.random.uniform(k2, (1, HIDDEN), jnp.float32, -bound1, bound1)
    w2t = jax.random.uniform(k3, (OUT, HIDDEN), jnp.float32, -bound2, bound2)        # (out, in)
    b2 = jax.random.uniform(k4, (OUT, 1), jnp.float32, -bound2, bound2)
    return w1, b1, w2t, b2


def reference(x, w1, b1, w2t, b2):
    h = jnp.maximum(x @ w1 + b1, 0.0)
    return h @ w2t.T + b2[:, 0]


if __name__ == "__main__":
    key = jax.random.PRNGKey(0)
    kx, kp = jax.random.split(key)
    w1, b1, w2t, b2 = init_params(kp)

    # Small batch: single block, block shapes equal full array dims.
    B = 16
    x = jax.random.normal(kx, (B, LATENT_DIM), jnp.float32)
    ref = reference(x, w1, b1, w2t, b2)
    out = jax.block_until_ready(motion_decoder(x, w1, b1, w2t, b2))
    assert out.shape == (B, OUT)
    assert jnp.allclose(out, ref, atol=1e-4, rtol=1e-4), "f32 mismatch vs reference"

    # Non-aligned batch (13 rows): still a single block, no padding or copy of x.
    out13 = jax.block_until_ready(motion_decoder(x[:13], w1, b1, w2t, b2))
    assert out13.shape == (13, OUT)
    assert jnp.allclose(out13, ref[:13], atol=1e-4, rtol=1e-4), "ragged small-batch mismatch"

    # Multi-step grid with a ragged tail block (640 rows, 256-row tiles).
    B2 = 640
    x2 = jax.random.normal(jax.random.PRNGKey(2), (B2, LATENT_DIM), jnp.float32)
    ref2 = reference(x2, w1, b1, w2t, b2)
    out2 = jax.block_until_ready(motion_decoder(x2, w1, b1, w2t, b2, block_batch=256))
    assert out2.shape == (B2, OUT)
    assert jnp.allclose(out2, ref2, atol=1e-4, rtol=1e-4), "multi-block / tail mismatch"

    # bf16 latents handed in by the caller (no wrapper cast): f32 MXU accumulation.
    x_bf = x.astype(jnp.bfloat16)
    ref_bf = reference(x_bf.astype(jnp.float32),
                       w1.astype(jnp.bfloat16).astype(jnp.float32), b1, w2t, b2)
    out_bf = jax.block_until_ready(motion_decoder(x_bf, w1, b1, w2t, b2))
    assert out_bf.shape == (B, OUT)
    assert jnp.allclose(out_bf.astype(jnp.float32), ref_bf, atol=2e-2, rtol=2e-2), \
        "bf16-input mismatch vs bf16-rounded reference"

    print("KERNEL_OK")
</pallas_src>

<mosaic_0001>
module attributes {stable_mosaic.version = 11 : i64} {
  func.func @motion_decoder_kernel(%arg0: i32, %arg1: memref<16x128xf32, #tpu.memory_space<vmem>>, %arg2: memref<128x64xf32, #tpu.memory_space<vmem>>, %arg3: memref<1x64xf32, #tpu.memory_space<vmem>>, %arg4: memref<3x64xf32, #tpu.memory_space<vmem>>, %arg5: memref<3x1xf32, #tpu.memory_space<vmem>>, %arg6: memref<3x16xf32, #tpu.memory_space<vmem>>) attributes {dimension_semantics = [#tpu.dimension_semantics<parallel>], iteration_bounds = array<i64: 1>, scalar_prefetch = 0 : i64, scratch_operands = 0 : i64, tpu.core_type = #tpu.core_type<tc>, window_params = [{transform_indices = @transform_0, window_bounds = array<i64: 16, 128>}, {pipeline_mode = #tpu.pipeline_mode<synchronous>, transform_indices = @transform_1, window_bounds = array<i64: 128, 64>}, {pipeline_mode = #tpu.pipeline_mode<synchronous>, transform_indices = @transform_2, window_bounds = array<i64: 1, 64>}, {pipeline_mode = #tpu.pipeline_mode<synchronous>, transform_indices = @transform_3, window_bounds = array<i64: 3, 64>}, {pipeline_mode = #tpu.pipeline_mode<synchronous>, transform_indices = @transform_4, window_bounds = array<i64: 3, 1>}, {transform_indices = @transform_5, window_bounds = array<i64: 3, 16>}]} {
    %c0 = arith.constant 0 : index
    %c0_0 = arith.constant 0 : index
    %0 = vector.load %arg1[%c0, %c0_0] : memref<16x128xf32, #tpu.memory_space<vmem>>, vector<16x128xf32>
    %c0_1 = arith.constant 0 : index
    %c0_2 = arith.constant 0 : index
    %1 = vector.load %arg2[%c0_1, %c0_2] : memref<128x64xf32, #tpu.memory_space<vmem>>, vector<128x64xf32>
    %cst = arith.constant dense<0.000000e+00> : vector<16x64xf32>
    %2 = tpu.matmul %0, %1, %cst {dimension_numbers = #tpu.dot_dimension_numbers<[1], [0], [0], [1], [0, 0, 1, 1], [], []>} : vector<16x128xf32>, vector<128x64xf32>, vector<16x64xf32> -> vector<16x64xf32>
    %c0_3 = arith.constant 0 : index
    %c0_4 = arith.constant 0 : index
    %3 = vector.load %arg3[%c0_3, %c0_4] : memref<1x64xf32, #tpu.memory_space<vmem>>, vector<1x64xf32>
    %4 = vector.broadcast %3 : vector<1x64xf32> to vector<16x64xf32>
    %5 = arith.addf %2, %4 : vector<16x64xf32>
    %cst_5 = arith.constant 0.000000e+00 : f32
    %6 = vector.broadcast %cst_5 : f32 to vector<16x64xf32>
    %7 = arith.maximumf %5, %6 : vector<16x64xf32>
    %c0_6 = arith.constant 0 : index
    %c0_7 = arith.constant 0 : index
    %8 = vector.load %arg4[%c0_6, %c0_7] : memref<3x64xf32, #tpu.memory_space<vmem>>, vector<3x64xf32>
    %cst_8 = arith.constant dense<0.000000e+00> : vector<3x16xf32>
    %9 = tpu.matmul %8, %7, %cst_8 {dimension_numbers = #tpu.dot_dimension_numbers<[1], [1], [0], [0], [0, 0, 1, 0], [], []>} : vector<3x64xf32>, vector<16x64xf32>, vector<3x16xf32> -> vector<3x16xf32>
    %c0_9 = arith.constant 0 : index
    %c0_10 = arith.constant 0 : index
    %10 = vector.load %arg5[%c0_9, %c0_10] : memref<3x1xf32, #tpu.memory_space<vmem>>, vector<3x1xf32>
    %11 = vector.broadcast %10 : vector<3x1xf32> to vector<3x16xf32>
    %12 = arith.addf %9, %11 : vector<3x16xf32>
    %c0_11 = arith.constant 0 : index
    %c0_12 = arith.constant 0 : index
    %13 = vector.load %arg6[%c0_11, %c0_12] : memref<3x16xf32, #tpu.memory_space<vmem>>, vector<3x16xf32>
    tpu.vector_store %arg6[%c0_11, %c0_12], %12 {strides = array<i32>} : memref<3x16xf32, #tpu.memory_space<vmem>>, vector<3x16xf32>,
    return
  }
  func.func @transform_0(%arg0: i32) -> (i32, i32) {
    %c0_i32 = arith.constant 0 : i32
    %c0_i32_0 = arith.constant 0 : i32
    return %arg0, %c0_i32 : i32, i32
  }
  func.func @transform_1(%arg0: i32) -> (i32, i32) {
    %c0_i32 = arith.constant 0 : i32
    %c0_i32_0 = arith.constant 0 : i32
    %c0_i32_1 = arith.constant 0 : i32
    return %c0_i32, %c0_i32_0 : i32, i32
  }
  func.func @transform_2(%arg0: i32) -> (i32, i32) {
    %c0_i32 = arith.constant 0 : i32
    %c0_i32_0 = arith.constant 0 : i32
    %c0_i32_1 = arith.constant 0 : i32
    return %c0_i32, %c0_i32_0 : i32, i32
  }
  func.func @transform_3(%arg0: i32) -> (i32, i32) {
    %c0_i32 = arith.constant 0 : i32
    %c0_i32_0 = arith.constant 0 : i32
    %c0_i32_1 = arith.constant 0 : i32
    return %c0_i32, %c0_i32_0 : i32, i32
  }
  func.func @transform_4(%arg0: i32) -> (i32, i32) {
    %c0_i32 = arith.constant 0 : i32
    %c0_i32_0 = arith.constant 0 : i32
    %c0_i32_1 = arith.constant 0 : i32
    return %c0_i32, %c0_i32_0 : i32, i32
  }
  func.func @transform_5(%arg0: i32) -> (i32, i32) {
    %c0_i32 = arith.constant 0 : i32
    %c0_i32_0 = arith.constant 0 : i32
    return %c0_i32, %arg0 : i32, i32
  }
}

</mosaic_0001>

<bundles_post_ra>
// kernel: tpu_custom_call.1
= control target key start
LH: loop header
LB: loop body
LE: loop exit
PB: predicated region body
PF: predicated region fallthrough
CT: control target
= control target key end

     0   :  { %s469_s0 = inlined_call_operand.vmem [shape: f32[16,128], index: 0, kind: input, shape index: {}]   ;;  %s470_s1 = inlined_call_operand.vmem [shape: f32[128,64], index: 1, kind: input, shape index: {}]   ;;  %s471_s2 = inlined_call_operand.vmem [shape: f32[1,64], index: 2, kind: input, shape index: {}]   ;;  %s472_s3 = inlined_call_operand.vmem [shape: f32[3,64], index: 3, kind: input, shape index: {}]   ;;  %s473_s4 = inlined_call_operand.vmem [shape: f32[3,1], index: 4, kind: input, shape index: {}]   ;;  %s474_s5 = inlined_call_operand.hbm [shape: f32[3,16], index: 5, kind: output, shape index: {}]  }
   0x1   :  { %v23_v0 = vld [vmem:[%s470_s1] sm:$0xff]  ;;  %v24_v1 = vld [vmem:[%s470_s1 + $0x8] sm:$0xff]  ;;  %v25_v2 = vld [vmem:[%s470_s1 + $0x10] sm:$0xff] }
   0x2   :  { %v293_v3 = vpack.c.bf16 %v24_v1, %v23_v0  ;;  %v26_v4 = vld [vmem:[%s470_s1 + $0x18] sm:$0xff]  ;;  %v27_v6 = vld [vmem:[%s470_s1 + $0x20] sm:$0xff]  ;;  %v28_v7 = vld [vmem:[%s470_s1 + $0x28] sm:$0xff] }
   0x3   :  { %v297_v5 = vpack.c.bf16 %v26_v4, %v25_v2  ;;  %v301_v8 = vpack.c.bf16 %v28_v7, %v27_v6  ;;  %v21_v9 = vld [vmem:[%s469_s0] sm:$0xff]  ;;  %v29_v10 = vld [vmem:[%s470_s1 + $0x30] sm:$0xff]  ;;  %v30_v11 = vld [vmem:[%s470_s1 + $0x38] sm:$0xff] }
   0x4   :  { %294 = vmatprep.subr.bf16.mxu0 %v293_v3  ;;  %283 = vmatprep.mubr.f32.mxu0 %v21_v9 }
   0x5   :  { %296 = vmatpush3.bf16.msra.mxu0 %v293_v3 }
   0x6   :  { %298 = vmatprep.subr.bf16.mxu0 %v297_v5 }
   0x7   :  { %10 = vsyncpa [#allocation3], 0  ;;  %v305_v12 = vpack.c.bf16 %v30_v11, %v29_v10  ;;  %v31_v13 = vld [vmem:[%s470_s1 + $0x40] sm:$0xff]  ;;  %v32_v14 = vld [vmem:[%s470_s1 + $0x48] sm:$0xff]  ;;  %v359_v26 = vmov 0.0|0.0   ;;  %vm360_vm0 = vmmov 0  }
   0x8   :  { %v309_v15 = vpack.c.bf16 %v32_v14, %v31_v13  ;;  %v33_v16 = vld [vmem:[%s470_s1 + $0x50] sm:$0xff]  ;;  %v34_v17 = vld [vmem:[%s470_s1 + $0x58] sm:$0xff]  ;;  %v35_v19 = vld [vmem:[%s470_s1 + $0x60] sm:$0xff]  ;;  %325 = vmatprep.subr.bf16.mxu1 %v359_v26  ;;  %v361_v27 = vmov 0.0   ;;  %v362_v29 = vmov 0   ;;  %vm130_vm1 = vcmask 523264  }
   0x9   :  { %300 = vmatpush3.bf16.msra.mxu0 %v297_v5  ;;  %v313_v18 = vpack.c.bf16 %v34_v17, %v33_v16  ;;  %v36_v20 = vld [vmem:[%s470_s1 + $0x68] sm:$0xff]  ;;  %v37_v22 = vld [vmem:[%s470_s1 + $0x70] sm:$0xff]  ;;  %v38_v23 = vld [vmem:[%s470_s1 + $0x78] sm:$0xff]  ;;  %290 = vmatprep.mubr.msk.f32.mxu1 %vm360_vm0, %v361_v27  ;;  %vm210_vm3 = vcmask 124928  }
   0xa   :  { %302 = vmatprep.subr.bf16.mxu0 %v301_v8  ;;  %v317_v21 = vpack.c.bf16 %v36_v20, %v35_v19  ;;  %v321_v24 = vpack.c.bf16 %v38_v23, %v37_v22  ;;  %v22_v25 = vld [vmem:[%s469_s0 + $0x8] sm:$0xff]  ;;  %v124_v28 = vld [vmem:[%s473_s4] sm:$0x7]  ;;  %334 = vset.pattern.permute.xlu0 %v362_v29  ;;  %vm327_vm2 = vmpackc.low %vm130_vm1, %vm130_vm1  ;;  %s363_s4 = smov [#allocation2]  }
   0xb   :  { %127 = vperm.xlu0 %334, %v124_v28   ;;  %v226_v30 = vld [vmem:[%s471_s2] ss:$0 sm:$0xff]  ;;  %s218_s8 = sshll.u32 %s363_s4, 4  ;;  %s219_s8 = int_to_ptr.vmem [resolvable:$true] %s218_s8 }
   0xc   :  { %v123_v38 = vld [vmem:[%s472_s3] sm:$0x7]  ;;  %s335_s2 = scalar_lea.vmem %s219_s8, 64  ;;  %p340_p1 = scmp.lt.s32.totalorder %s219_s8, %s219_s8 }
   0xd   :  { %304 = vmatpush3.bf16.msra.mxu0 %v301_v8  ;;  %p336_p0 = scmp.ne.s32.totalorder %s219_s8, %s335_s2  ;;  %p341_p2 = scmp.lt.s32.totalorder %s335_s2, %s335_s2 }
   0xe   :  { %306 = vmatprep.subr.bf16.mxu0 %v305_v12 }
   0xf   :  { %p342_p3 = por %p341_p2, %p340_p1 }
  0x11   :  { %308 = vmatpush3.bf16.msra.mxu0 %v305_v12  ;;  %p343_p4 = pnand %p342_p3, %p336_p0 }
  0x12   :  { %310 = vmatprep.subr.bf16.mxu0 %v309_v15 }
  0x15   :  { %312 = vmatpush3.bf16.msra.mxu0 %v309_v15 }
  0x16   :  { %314 = vmatprep.subr.bf16.mxu0 %v313_v18 }
  0x19   :  { %316 = vmatpush3.bf16.msra.mxu0 %v313_v18 }
  0x1a   :  { %318 = vmatprep.subr.bf16.mxu0 %v317_v21 }
  0x1d   :  { %320 = vmatpush3.bf16.msra.mxu0 %v317_v21 }
  0x1e   :  { %322 = vmatprep.subr.bf16.mxu0 %v321_v24 }
  0x21   :  { %324 = vmatpush3.bf16.msra.mxu0 %v321_v24 }
  0x24   :  { %284 = vmatmul.mubr.f32.vlgmr.msra.gmra.mrb[0].mxu0 %v22_v25 }
  0x8a   :  { %v128_v39 = vpop.permute.xlu0 %127 }
  0xf7   :  { %v285_v31 = vpop.f32.mrb[0].mxu0 }
  0xf8   :  { %v118_v32 = vadd.f32 %v285_v31, %v226_v30  ;;  %v112_v33 = vpop.f32.mrb[1].mxu0 }
  0xf9   :  { %v113_v34 = vadd.f32 %v226_v30, %v112_v33 }
  0xfa   :  { %v122_v35 = vmax.f32 %v118_v32, 0.0 }
  0xfb   :  { %v121_v36 = vmax.f32 %v113_v34, 0.0 }
  0xfd   :  { %v326_v37 = vpack.c.bf16 %v122_v35, %v121_v36 }
  0xff   :  { %328 = vmatpush3.bf16.xpose.msk.msra.mxu1 %vm327_vm2, %v326_v37 }
 0x106   :  { %291 = vmatmul.mubr.msk.f32.vlgmr.msra.gmra.mrb[0].mxu1 %vm130_vm1, %v123_v38 }
 0x1d9   :  { %v206_v40 = vpop.f32.mrb[0].mxu1 }
 0x1da   :  { %v207_v41 = vadd.f32 %v206_v40, %v128_v39  ;;  %v292_v42 = vpop.f32.mrb[1].mxu1 }
 0x1dc   :  { %211 = vst.msk [vmem:[#allocation2] sm:$0x7] %vm210_vm3, %v207_v41 }
 0x1dd   :  { %346 = shalt.err (!%p343_p4)
}
 0x1de   :  { %s347_s3 = scalar_lea.hbm %s474_s5, 64 }
 0x1df   :  { %p348_p5 = scmp.ne.s32.totalorder %s474_s5, %s347_s3  ;;  %p351_p6 = scmp.lt.u32.totalorder %s347_s3, %s474_s5 }
 0x1e1   :  { %p353_p7 = pnand %p351_p6, %p348_p5 }
 0x1e3   :  { %356 = shalt.err (!%p353_p7)
}
 0x1e4   :  { %221 = dma.vmem_to_hbm [thread:$0]  %s219_s8, 64, %s474_s5, [#allocation3]  }
 0x1e5   :  { %357 = dma.done.wait [#allocation3], 64  }
 0x1e6   :  { %358 = vsyncadd [#allocation3], 4294967232 }
 0x1e7   :  { %225 = vsyncpa [#allocation3], 1 }

</bundles_post_ra>
